<compile_context>
chip_gen: v7x
topology: tpu7x:2x2x1
jax: 0.10.0
libtpu: 0.0.40
codegen_flags: <defaults>
</compile_context>

<pallas_src>
import functools

import numpy as np
import jax
import jax.numpy as jnp
from jax import lax
from jax.experimental import pallas as pl
from jax.experimental.pallas import tpu as pltpu


# ------------------------------- parameter setup (plain JAX glue) -------------------------

def glorot_init(key, input_dim, output_dim):
    init_range = np.sqrt(6.0 / (input_dim + output_dim))
    u = jax.random.uniform(key, (input_dim, output_dim), dtype=jnp.float32)
    return u * 2.0 * init_range - init_range


def normalize_adj(adj):
    adj_ = adj + jnp.eye(adj.shape[0], dtype=adj.dtype)
    rowsum = jnp.sum(adj_, axis=1)
    d_inv_sqrt = jnp.diag(jnp.power(rowsum, -0.5))
    return d_inv_sqrt @ adj_ @ d_inv_sqrt


# ------------------------------- Pallas kernel --------------------------------------------

def belief_encoder_kernel(adj_ref, x_ref, w1_ref, wms_ref, noise_ref, out_ref, *,
                          embedding_dim):
    adj = adj_ref[...]            # (N, N)
    x = x_ref[...]                # (N, F)

    # hidden = relu(adj @ (x @ W1))
    xw = jnp.dot(x, w1_ref[...], preferred_element_type=jnp.float32)         # (N, H)
    hidden = jnp.maximum(jnp.dot(adj, xw, preferred_element_type=jnp.float32), 0.0)

    # Fused mean / logstd: single (H, 2E) RHS -> single adj matmul, sliced afterwards.
    hms = jnp.dot(hidden, wms_ref[...], preferred_element_type=jnp.float32)  # (N, 2E)
    ams = jnp.dot(adj, hms, preferred_element_type=jnp.float32)              # (N, 2E)
    mean = ams[:, :embedding_dim]
    logstd = ams[:, embedding_dim:]

    # reparameterization + relu
    z = jnp.maximum(noise_ref[...] * jnp.exp(logstd) + mean, 0.0)            # (N, E)

    # decode: contract z's last dim against itself (no explicit transpose), then
    # 2*sigmoid(x) - 1 == tanh(x/2)  (single EUP op).
    logits = lax.dot_general(z, z, (((1,), (1,)), ((), ())),
                             preferred_element_type=jnp.float32)             # (N, N)
    out_ref[...] = jnp.tanh(0.5 * logits)


def belief_encoder_forward(adj_norm, x, w1, wm, ws, noise):
    n, f = x.shape
    h = w1.shape[1]
    e = wm.shape[1]

    # Fuse the mean / log-std weights on the lane dim (done once in the wrapper).
    wms = jnp.concatenate([wm, ws], axis=1)   # (H, 2E)

    flops = 2 * (n * f * h            # x @ W1
                 + n * n * h          # adj @ xw
                 + n * h * 2 * e      # hidden @ Wms
                 + n * n * 2 * e      # adj @ hms
                 + n * n * e)         # z z^T
    transcendentals = n * e + n * n   # exp(logstd) + tanh(logits)
    bytes_accessed = 4 * (n * n + n * f + f * h + h * 2 * e + n * e   # inputs
                          + n * n)                                    # output

    vmem_spec = pl.BlockSpec(memory_space=pltpu.MemorySpace.VMEM)
    kernel = functools.partial(belief_encoder_kernel, embedding_dim=e)

    return pl.pallas_call(
        kernel,
        out_shape=jax.ShapeDtypeStruct((n, n), jnp.float32),
        in_specs=[vmem_spec] * 5,
        out_specs=vmem_spec,
        cost_estimate=pl.CostEstimate(flops=flops,
                                      transcendentals=transcendentals,
                                      bytes_accessed=bytes_accessed),
    )(adj_norm, x, w1, wms, noise)


# ------------------------------- reference (pure JAX) for sanity --------------------------

def belief_encoder_ref(adj_norm, x, w1, wm, ws, noise):
    hidden = jax.nn.relu(adj_norm @ (x @ w1))
    mean = adj_norm @ (hidden @ wm)
    logstd = adj_norm @ (hidden @ ws)
    z = jax.nn.relu(noise * jnp.exp(logstd) + mean)
    return 2.0 * jax.nn.sigmoid(z @ z.T) - 1.0


# ------------------------------- main ------------------------------------------------------

if __name__ == "__main__":
    N = 8            # number of graph nodes (= init_adj.shape[0] = x.shape[0])
    FEATURE_DIM = 16
    HIDDEN_DIM = 32
    EMBEDDING_DIM = 16

    key = jax.random.PRNGKey(0)
    k_adj, k_x, k_w1, k_wm, k_ws, k_noise = jax.random.split(key, 6)

    # deterministic symmetric 0/1 adjacency with zero diagonal
    a = (jax.random.uniform(k_adj, (N, N)) > 0.5).astype(jnp.float32)
    init_adj = jnp.triu(a, 1)
    init_adj = init_adj + init_adj.T

    adj_norm = normalize_adj(init_adj).astype(jnp.float32)

    x = jax.random.normal(k_x, (N, FEATURE_DIM), dtype=jnp.float32)

    w1 = glorot_init(k_w1, FEATURE_DIM, HIDDEN_DIM)
    wm = glorot_init(k_wm, HIDDEN_DIM, EMBEDDING_DIM)
    ws = glorot_init(k_ws, HIDDEN_DIM, EMBEDDING_DIM)

    # reparameterization noise (torch.randn equivalent), generated deterministically in JAX
    noise = jax.random.normal(k_noise, (N, EMBEDDING_DIM), dtype=jnp.float32)

    out = belief_encoder_forward(adj_norm, x, w1, wm, ws, noise)
    out = jax.block_until_ready(out)

    ref = belief_encoder_ref(adj_norm, x, w1, wm, ws, noise)
    np.testing.assert_allclose(np.asarray(out), np.asarray(ref), rtol=1e-5, atol=1e-5)

    print("KERNEL_OK")
</pallas_src>

<mosaic_0001>
module attributes {stable_mosaic.version = 11 : i64} {
  func.func @belief_encoder_kernel(%arg0: memref<8x8xf32, #tpu.memory_space<vmem>>, %arg1: memref<8x16xf32, #tpu.memory_space<vmem>>, %arg2: memref<16x32xf32, #tpu.memory_space<vmem>>, %arg3: memref<32x32xf32, #tpu.memory_space<vmem>>, %arg4: memref<8x16xf32, #tpu.memory_space<vmem>>, %arg5: memref<8x8xf32, #tpu.memory_space<vmem>>) attributes {dimension_semantics = [], scalar_prefetch = 0 : i64, scratch_operands = 0 : i64, tpu.core_type = #tpu.core_type<tc>} {
    %c0 = arith.constant 0 : index
    %c0_0 = arith.constant 0 : index
    %0 = vector.load %arg0[%c0, %c0_0] : memref<8x8xf32, #tpu.memory_space<vmem>>, vector<8x8xf32>
    %c0_1 = arith.constant 0 : index
    %c0_2 = arith.constant 0 : index
    %1 = vector.load %arg1[%c0_1, %c0_2] : memref<8x16xf32, #tpu.memory_space<vmem>>, vector<8x16xf32>
    %c0_3 = arith.constant 0 : index
    %c0_4 = arith.constant 0 : index
    %2 = vector.load %arg2[%c0_3, %c0_4] : memref<16x32xf32, #tpu.memory_space<vmem>>, vector<16x32xf32>
    %cst = arith.constant dense<0.000000e+00> : vector<8x32xf32>
    %3 = tpu.matmul %1, %2, %cst {dimension_numbers = #tpu.dot_dimension_numbers<[1], [0], [0], [1], [0, 0, 1, 1], [], []>} : vector<8x16xf32>, vector<16x32xf32>, vector<8x32xf32> -> vector<8x32xf32>
    %cst_5 = arith.constant dense<0.000000e+00> : vector<8x32xf32>
    %4 = tpu.matmul %0, %3, %cst_5 {dimension_numbers = #tpu.dot_dimension_numbers<[1], [0], [0], [1], [0, 0, 1, 1], [], []>} : vector<8x8xf32>, vector<8x32xf32>, vector<8x32xf32> -> vector<8x32xf32>
    %cst_6 = arith.constant 0.000000e+00 : f32
    %5 = vector.broadcast %cst_6 : f32 to vector<8x32xf32>
    %6 = arith.maximumf %4, %5 : vector<8x32xf32>
    %c0_7 = arith.constant 0 : index
    %c0_8 = arith.constant 0 : index
    %7 = vector.load %arg3[%c0_7, %c0_8] : memref<32x32xf32, #tpu.memory_space<vmem>>, vector<32x32xf32>
    %cst_9 = arith.constant dense<0.000000e+00> : vector<8x32xf32>
    %8 = tpu.matmul %6, %7, %cst_9 {dimension_numbers = #tpu.dot_dimension_numbers<[1], [0], [0], [1], [0, 0, 1, 1], [], []>} : vector<8x32xf32>, vector<32x32xf32>, vector<8x32xf32> -> vector<8x32xf32>
    %cst_10 = arith.constant dense<0.000000e+00> : vector<8x32xf32>
    %9 = tpu.matmul %0, %8, %cst_10 {dimension_numbers = #tpu.dot_dimension_numbers<[1], [0], [0], [1], [0, 0, 1, 1], [], []>} : vector<8x8xf32>, vector<8x32xf32>, vector<8x32xf32> -> vector<8x32xf32>
    %10 = vector.extract_strided_slice %9 {offsets = [0, 0], sizes = [8, 16], strides = [1, 1]} : vector<8x32xf32> to vector<8x16xf32>
    %11 = vector.extract_strided_slice %9 {offsets = [0, 16], sizes = [8, 16], strides = [1, 1]} : vector<8x32xf32> to vector<8x16xf32>
    %c0_11 = arith.constant 0 : index
    %c0_12 = arith.constant 0 : index
    %12 = vector.load %arg4[%c0_11, %c0_12] : memref<8x16xf32, #tpu.memory_space<vmem>>, vector<8x16xf32>
    %13 = math.exp %11 : vector<8x16xf32>
    %14 = arith.mulf %12, %13 : vector<8x16xf32>
    %15 = arith.addf %14, %10 : vector<8x16xf32>
    %cst_13 = arith.constant 0.000000e+00 : f32
    %16 = vector.broadcast %cst_13 : f32 to vector<8x16xf32>
    %17 = arith.maximumf %15, %16 : vector<8x16xf32>
    %cst_14 = arith.constant dense<0.000000e+00> : vector<8x8xf32>
    %18 = tpu.matmul %17, %17, %cst_14 {dimension_numbers = #tpu.dot_dimension_numbers<[1], [1], [0], [0], [0, 0, 1, 0], [], []>} : vector<8x16xf32>, vector<8x16xf32>, vector<8x8xf32> -> vector<8x8xf32>
    %cst_15 = arith.constant 5.000000e-01 : f32
    %19 = vector.broadcast %cst_15 : f32 to vector<8x8xf32>
    %20 = arith.mulf %19, %18 : vector<8x8xf32>
    %21 = math.tanh %20 : vector<8x8xf32>
    %c0_16 = arith.constant 0 : index
    %c0_17 = arith.constant 0 : index
    %22 = vector.load %arg5[%c0_16, %c0_17] : memref<8x8xf32, #tpu.memory_space<vmem>>, vector<8x8xf32>
    tpu.vector_store %arg5[%c0_16, %c0_17], %21 {strides = array<i32>} : memref<8x8xf32, #tpu.memory_space<vmem>>, vector<8x8xf32>,
    return
  }
}

</mosaic_0001>

<bundles_post_ra>
// kernel: tpu_custom_call.1
= control target key start
LH: loop header
LB: loop body
LE: loop exit
PB: predicated region body
PF: predicated region fallthrough
CT: control target
= control target key end

     0   :  { %10 = vsyncpa [#allocation3], 0  ;;  %s786_s0 = inlined_call_operand.hbm [shape: f32[8,8], index: 0, kind: input, shape index: {}]   ;;  %s787_s1 = inlined_call_operand.hbm [shape: f32[8,16], index: 1, kind: input, shape index: {}]   ;;  %s788_s2 = inlined_call_operand.hbm [shape: f32[16,32], index: 2, kind: input, shape index: {}]   ;;  %s789_s3 = inlined_call_operand.hbm [shape: f32[32,32], index: 3, kind: input, shape index: {}]   ;;  %s790_s4 = inlined_call_operand.vmem [shape: f32[8,16], index: 4, kind: input, shape index: {}]   ;;  %s791_s5 = inlined_call_operand.hbm [shape: f32[8,8], index: 5, kind: output, shape index: {}]  }
   0x1   :  { %11 = vsyncpa [#allocation6], 0 }
   0x2   :  { %12 = vsyncpa [#allocation9], 0 }
   0x3   :  { %13 = vsyncpa [#allocation4], 0  ;;  %s671_s18 = smov [#allocation5]   ;;  %s672_s20 = smov [#allocation2]  }
   0x4   :  { %s30_s19 = sshll.u32 %s671_s18, 4  ;;  %s20_s21 = sshll.u32 %s672_s20, 4  ;;  %s31_s19 = int_to_ptr.vmem [resolvable:$true] %s30_s19  ;;  %s21_s21 = int_to_ptr.vmem [resolvable:$true] %s20_s21 }
   0x5   :  { %s553_s24 = scalar_lea.hbm %s787_s1, 128 }
   0x6   :  { %p554_p0 = scmp.ne.s32.totalorder %s787_s1, %s553_s24  ;;  %p557_p1 = scmp.lt.u32.totalorder %s553_s24, %s787_s1 }
   0x8   :  { %p559_p2 = pnand %p557_p1, %p554_p0 }
   0xa   :  { %562 = shalt.err (!%p559_p2)
}
   0xb   :  { %s563_s29 = scalar_lea.vmem %s31_s19, 128  ;;  %p568_p4 = scmp.lt.s32.totalorder %s31_s19, %s31_s19 }
   0xc   :  { %p564_p3 = scmp.ne.s32.totalorder %s31_s19, %s563_s29  ;;  %p569_p5 = scmp.lt.s32.totalorder %s563_s29, %s563_s29 }
   0xe   :  { %p570_p6 = por %p569_p5, %p568_p4 }
  0x10   :  { %p571_p7 = pnand %p570_p6, %p564_p3 }
  0x12   :  { %574 = shalt.err (!%p571_p7)
}
  0x13   :  { %33 = dma.hbm_to_vmem [thread:$0]  %s787_s1, 128, %s31_s19, [#allocation6]  }
  0x14   :  { %s575_s9 = scalar_lea.hbm %s786_s0, 128 }
  0x15   :  { %p576_p8 = scmp.ne.s32.totalorder %s786_s0, %s575_s9  ;;  %p579_p9 = scmp.lt.u32.totalorder %s575_s9, %s786_s0 }
  0x17   :  { %p581_p10 = pnand %p579_p9, %p576_p8 }
  0x19   :  { %584 = shalt.err (!%p581_p10)
}
  0x1a   :  { %s585_s14 = scalar_lea.vmem %s21_s21, 128  ;;  %p590_p12 = scmp.lt.s32.totalorder %s21_s21, %s21_s21 }
  0x1b   :  { %p586_p11 = scmp.ne.s32.totalorder %s21_s21, %s585_s14  ;;  %p591_p13 = scmp.lt.s32.totalorder %s585_s14, %s585_s14 }
  0x1d   :  { %p592_p0 = por %p591_p13, %p590_p12 }
  0x1f   :  { %p593_p1 = pnand %p592_p0, %p586_p11 }
  0x21   :  { %596 = shalt.err (!%p593_p1)
}
  0x22   :  { %23 = dma.hbm_to_vmem [thread:$0]  %s786_s0, 128, %s21_s21, [#allocation3]  }
  0x23   :  { %s673_s16 = smov [#allocation7]   ;;  %s597_s20 = scalar_lea.hbm %s788_s2, 256 }
  0x24   :  { %s39_s17 = sshll.u32 %s673_s16, 4  ;;  %p598_p2 = scmp.ne.s32.totalorder %s788_s2, %s597_s20  ;;  %s40_s17 = int_to_ptr.vmem [resolvable:$true] %s39_s17 }
  0x25   :  { %p601_p3 = scmp.lt.u32.totalorder %s597_s20, %s788_s2 }
  0x27   :  { %p603_p4 = pnand %p601_p3, %p598_p2 }
  0x29   :  { %606 = shalt.err (!%p603_p4)
}
  0x2a   :  { %s607_s26 = scalar_lea.vmem %s40_s17, 256  ;;  %p612_p6 = scmp.lt.s32.totalorder %s40_s17, %s40_s17 }
  0x2b   :  { %p608_p5 = scmp.ne.s32.totalorder %s40_s17, %s607_s26  ;;  %p613_p7 = scmp.lt.s32.totalorder %s607_s26, %s607_s26 }
  0x2d   :  { %p614_p8 = por %p613_p7, %p612_p6 }
  0x2f   :  { %p615_p9 = pnand %p614_p8, %p608_p5 }
  0x31   :  { %618 = shalt.err (!%p615_p9)
}
  0x32   :  { %s674_s0 = smov 128   ;;  %s675_s21 = smov 8  }
  0x33   :  { %45 = dma.hbm_to_vmem [thread:$0]  %s788_s2, 256, %s40_s17, [#allocation6], %s674_s0, %s674_s0, %s675_s21  }
  0x34   :  { %s676_s29 = smov [#allocation8]   ;;  %s619_s8 = scalar_lea.hbm %s789_s3, 512 }
  0x35   :  { %s51_s30 = sshll.u32 %s676_s29, 4  ;;  %p620_p10 = scmp.ne.s32.totalorder %s789_s3, %s619_s8  ;;  %s52_s30 = int_to_ptr.vmem [resolvable:$true] %s51_s30 }
  0x36   :  { %p623_p11 = scmp.lt.u32.totalorder %s619_s8, %s789_s3 }
  0x38   :  { %p625_p12 = pnand %p623_p11, %p620_p10 }
  0x3a   :  { %628 = shalt.err (!%p625_p12)
}
  0x3b   :  { %s629_s13 = scalar_lea.vmem %s52_s30, 512  ;;  %p634_p0 = scmp.lt.s32.totalorder %s52_s30, %s52_s30 }
  0x3c   :  { %p630_p13 = scmp.ne.s32.totalorder %s52_s30, %s629_s13  ;;  %p635_p1 = scmp.lt.s32.totalorder %s629_s13, %s629_s13 }
  0x3e   :  { %p636_p2 = por %p635_p1, %p634_p0 }
  0x40   :  { %p637_p3 = pnand %p636_p2, %p630_p13 }
  0x42   :  { %640 = shalt.err (!%p637_p3)
}
  0x43   :  { %57 = dma.hbm_to_vmem [thread:$0]  %s789_s3, 512, %s52_s30, [#allocation9], %s674_s0, %s674_s0, %s675_s21  }
  0x44   :  { %663 = dma.done.wait [#allocation3], 128  }
  0x45   :  { %664 = vsyncadd [#allocation3], 4294967168 }
  0x46   :  { %665 = dma.done.wait [#allocation6], 384  }
  0x47   :  { %666 = vsyncadd [#allocation6], 4294966912 }
  0x48   :  { %667 = dma.done.wait [#allocation9], 512  }
  0x49   :  { %668 = vsyncadd [#allocation9], 4294966784  ;;  %v677_v0 = vmov 0.0|0.0   ;;  %vm678_vm0 = vmmov 0   ;;  %v679_v1 = vmov 0.0   ;;  %v74_v2 = vld [vmem:[#allocation7] sm:$0xff] }
  0x4a   :  { %529 = vmatprep.subr.bf16.mxu0 %v677_v0  ;;  %500 = vmatprep.mubr.msk.f32.mxu0 %vm678_vm0, %v679_v1  ;;  %v75_v3 = vld [vmem:[#allocation7 + $0x8] sm:$0xff]  ;;  %v73_v5 = vld [vmem:[#allocation5] sm:$0xff]  ;;  %vm76_vm1 = vcmask 130048   ;;  %v225_v6 = vld [vmem:[#allocation8] sm:$0xff]  ;;  %vm150_vm2 = vcmask 64512   ;;  %vm229_vm3 = vcmask 261120  }
  0x4b   :  { %503 = vmatprep.subr.mxu1 %v679_v1  ;;  %505 = vmatprep.mubr.msk.f32.mxu1 %vm678_vm0, %v679_v1  ;;  %v530_v4 = vpack.c.bf16 %v75_v3, %v74_v2  ;;  %v226_v7 = vld [vmem:[#allocation8 + $0x8] sm:$0xff]  ;;  %v72_v8 = vld [vmem:[#allocation2] sm:$0xff]  ;;  %v227_v12 = vld [vmem:[#allocation8 + $0x10] sm:$0xff]  ;;  %s680_s3 = smov 112   ;;  %s681_s16 = smov [#allocation10]  }
  0x4c   :  { %v533_v9 = vpack.c.bf16 %v226_v7, %v225_v6  ;;  %v228_v13 = vld [vmem:[#allocation8 + $0x18] sm:$0xff]  ;;  %v373_v24 = vld [vmem:[%s790_s4] sm:$0xff]  ;;  %s465_s17 = sshll.u32 %s681_s16, 4  ;;  %s466_s17 = int_to_ptr.vmem [resolvable:$true] %s465_s17 }
  0x4d   :  { %531 = vmatpush3.bf16.msra.mxu0 %v530_v4  ;;  %v536_v14 = vpack.c.bf16 %v228_v13, %v227_v12  ;;  %s641_s18 = scalar_lea.vmem %s466_s17, 128  ;;  %p646_p5 = scmp.lt.s32.totalorder %s466_s17, %s466_s17 }
  0x4e   :  { %519 = vmatprep.subr.mxu0 %v679_v1  ;;  %p642_p4 = scmp.ne.s32.totalorder %s466_s17, %s641_s18  ;;  %p647_p6 = scmp.lt.s32.totalorder %s641_s18, %s641_s18 }
  0x50   :  { %501 = vmatmul.mubr.msk.f32.vlgmr.msra.gmra.mrb[0].mxu0 %vm76_vm1, %v73_v5  ;;  %p648_p7 = por %p647_p6, %p646_p5 }
  0x51   :  { %521 = vmatprep.mubr.msk.f32.mxu0 %vm678_vm0, %v679_v1 }
  0x52   :  { %p649_p8 = pnand %p648_p7, %p642_p4 }
 0x123   :  { %v146_v10 = vpop.f32.mrb[0].mxu0 }
 0x124   :  { %v502_v11 = vpop.f32.mrb[1].mxu0  ;;  %504 = vmatpush3.msra.mxu1 %v146_v10 }
 0x125   :  { %506 = vmatmul.mubr.msk.f32.vlgmr.msra.gmra.mrb[0].mxu1 %vm150_vm2, %v72_v8  ;;  %532 = vmatprep.subr.bf16.mxu1 %v677_v0 }
 0x126   :  { %534 = vmatpush3.bf16.msra.mxu1 %v533_v9  ;;  %516 = vmatprep.mubr.msk.f32.mxu1 %vm678_vm0, %v679_v1 }
 0x127   :  { %535 = vmatprep.subr.bf16.mxu1 %v677_v0 }
 0x12a   :  { %537 = vmatpush3.bf16.msra.mxu1 %v536_v14 }
 0x1f8   :  { %v220_v15 = vpop.f32.mrb[0].mxu1 }
 0x1f9   :  { %v224_v16 = vmax.f32 %v220_v15, 0.0  ;;  %v507_v17 = vpop.f32.mrb[1].mxu1 }
 0x1fb   :  { %517 = vmatmul.mubr.msk.f32.vlgmr.msra.gmra.mrb[2].mxu1 %vm229_vm3, %v224_v16 }
 0x2ce   :  { %v299_v18 = vpop.f32.mrb[2].mxu1 }
 0x2cf   :  { %v518_v19 = vpop.f32.mrb[3].mxu1  ;;  %520 = vmatpush3.msra.mxu0 %v299_v18 }
 0x2d0   :  { %522 = vmatmul.mubr.msk.f32.vlgmr.msra.gmra.mrb[2].mxu0 %vm150_vm2, %v72_v8  ;;  %524 = vmatprep.subr.mxu0 %v679_v1 }
 0x2d1   :  { %526 = vmatprep.mubr.msk.f32.mxu0 %vm678_vm0, %v679_v1 }
 0x3a3   :  { %v369_v20 = vpop.f32.mrb[2].mxu0 }
 0x3a4   :  { %v374_v21 = vmul.f32 1.442695, %v369_v20  ;;  %v523_v22 = vpop.f32.mrb[3].mxu0 }
 0x3a6   :  { %549 = vpow2.f32 %v374_v21 }
 0x3b0   :  { %v550_v23 = vpop.eup %549 }
 0x3b1   :  { %377 = vrot.lane.b32.xlu0 %v550_v23, %s680_s3 }
 0x423   :  { %v378_v25 = vpop.permute.xlu0 %377 }
 0x424   :  { %v380_v26 = vmul.f32 %v378_v25, %v373_v24 }
 0x426   :  { %v381_v27 = vadd.f32 %v380_v26, %v369_v20 }
 0x428   :  { %v382_v28 = vmax.f32 %v381_v27, 0.0 }
 0x42a   :  { %525 = vmatpush3.xpose.msk.msra.mxu0 %vm76_vm1, %v382_v28 }
 0x42d   :  { %527 = vmatmul.mubr.msk.f32.vlgmr.msra.gmra.mrb[4].mxu0 %vm76_vm1, %v382_v28 }
 0x500   :  { %v452_v29 = vpop.f32.mrb[4].mxu0 }
 0x501   :  { %v456_v30 = vmul.f32 0.5, %v452_v29  ;;  %v528_v31 = vpop.f32.mrb[5].mxu0 }
 0x503   :  { %551 = vtanh.f32 %v456_v30 }
 0x50d   :  { %v552_v32 = vpop.eup %551 }
 0x50e   :  { %458 = vst.msk [vmem:[#allocation10] sm:$0xff] %vm150_vm2, %v552_v32 }
 0x50f   :  { %652 = shalt.err (!%p649_p8)
}
 0x510   :  { %s653_s20 = scalar_lea.hbm %s791_s5, 128 }
 0x511   :  { %p654_p9 = scmp.ne.s32.totalorder %s791_s5, %s653_s20  ;;  %p657_p10 = scmp.lt.u32.totalorder %s653_s20, %s791_s5 }
 0x513   :  { %p659_p11 = pnand %p657_p10, %p654_p9 }
 0x515   :  { %662 = shalt.err (!%p659_p11)
}
 0x516   :  { %468 = dma.vmem_to_hbm [thread:$0]  %s466_s17, 128, %s791_s5, [#allocation4]  }
 0x517   :  { %669 = dma.done.wait [#allocation4], 128  }
 0x518   :  { %670 = vsyncadd [#allocation4], 4294967168 }
 0x519   :  { %472 = vsyncpa [#allocation3], 1 }
 0x51a   :  { %473 = vsyncpa [#allocation6], 1 }
 0x51b   :  { %474 = vsyncpa [#allocation9], 1 }
 0x51c   :  { %475 = vsyncpa [#allocation4], 1 }

</bundles_post_ra>
